<compile_context>
chip_gen: v7x
topology: tpu7x:2x2x1
jax: 0.10.0
libtpu: 0.0.40
codegen_flags: <defaults>
</compile_context>

<pallas_src>
import functools

import jax
import jax.numpy as jnp
from jax.experimental import pallas as pl
from jax.experimental.pallas import tpu as pltpu


def _round_up(x, m):
    return ((x + m - 1) // m) * m


# ---------------------------------------------------------------------------
# Fused kernel: the whole autoencoder forward for one batch tile.
#   refs = (x_ref, w0, b0, w1, b1, ..., o_ref)
# Weights arrive pre-cast to bf16 (MXU operand dtype); biases and the running
# activation stay f32 so the VPU/EUP never see bf16 (important on v5e).
# ---------------------------------------------------------------------------
def _fused_forward_kernel(*refs, sigmoid_flags):
    x_ref = refs[0]
    o_ref = refs[-1]
    param_refs = refs[1:-1]  # interleaved (w, b) pairs in forward order

    h = x_ref[...].astype(jnp.float32)
    for i, apply_sigmoid in enumerate(sigmoid_flags):
        w = param_refs[2 * i][...]        # (K, N) bf16
        b = param_refs[2 * i + 1][...]    # (1, N) f32 -> broadcasts over rows
        # bf16 operands into the MXU, f32 accumulation.
        h = jnp.dot(h.astype(jnp.bfloat16), w,
                    preferred_element_type=jnp.float32) + b
        if apply_sigmoid:
            # sigmoid(x) == 0.5 * tanh(0.5 * x) + 0.5 : single EUP op per
            # element; the mul/add ride on spare VALU slots.
            h = 0.5 * jnp.tanh(0.5 * h) + 0.5
    o_ref[...] = h.astype(o_ref.dtype)


def fused_forward(x, params, sigmoid_flags, *, tile_m=None):
    """Run the full autoencoder forward in a single Pallas kernel.

    x:      (B, D_in) float32
    params: list of (W (K, N), b (1, N)) in forward order (already fused
            across the activation-free bottleneck pair).
    """
    B, d_in = x.shape
    d_out = params[-1][0].shape[1]

    # Adaptive batch tile:
    #  - small batches: round up to the sublane multiple (8) -> no padding
    #    copy, no redundant MXU rows for e.g. B=8;
    #  - large batches: 256-row tiles (full MXU width on v6e/v7x) but never
    #    fewer than 2 grid steps so both v7x TensorCores get work.
    if tile_m is None:
        if B <= 256:
            tile_m = _round_up(B, 8)
        else:
            tile_m = min(256, _round_up(pl.cdiv(B, 2), 8))

    b_pad = _round_up(B, tile_m)
    if b_pad != B:
        # Only pads up to tile_m-1 rows (<= 7 rows for small batches).
        x = jnp.pad(x, ((0, b_pad - B), (0, 0)))

    in_specs = [pl.BlockSpec((tile_m, d_in), lambda i: (i, 0))]
    flat_params = []
    for w, b in params:
        k, n = w.shape
        # Full-array blocks with a constant index_map: resident in VMEM and
        # not re-fetched when the block index is unchanged across grid steps.
        in_specs.append(pl.BlockSpec((k, n), lambda i: (0, 0)))
        in_specs.append(pl.BlockSpec((1, n), lambda i: (0, 0)))
        flat_params.append(w.astype(jnp.bfloat16))   # MXU operand dtype
        flat_params.append(b.astype(jnp.float32))    # bias add stays f32

    kernel = functools.partial(
        _fused_forward_kernel,
        sigmoid_flags=tuple(bool(f) for f in sigmoid_flags),
    )

    out = pl.pallas_call(
        kernel,
        out_shape=jax.ShapeDtypeStruct((b_pad, d_out), x.dtype),
        grid=(b_pad // tile_m,),
        in_specs=in_specs,
        out_specs=pl.BlockSpec((tile_m, d_out), lambda i: (i, 0)),
        compiler_params=pltpu.CompilerParams(
            # Independent batch tiles -> megacore sharding on v7x.
            dimension_semantics=("parallel",),
        ),
    )(x, *flat_params)

    return out if b_pad == B else out[:B]


# ---------------------------------------------------------------------------
# NaiveDeepAutoencoder in JAX; forward runs through the single fused kernel.
# ---------------------------------------------------------------------------
class NaiveDeepAutoencoderPallas:
    def __init__(self, layers, key):
        self.layers = layers
        self.enc_params = []  # (W (in,out), b (1,out))
        dec_build = []

        prev_layer = layers[0]
        for layer in layers[1:]:
            key, k1, k2, k3, k4 = jax.random.split(key, 5)
            # PyTorch default Linear init: U(-1/sqrt(fan_in), 1/sqrt(fan_in)).
            # NOTE: weights stored as (in, out) = transpose of nn.Linear's
            # (out, in); loading real PyTorch weights would require W.T.
            bound_e = 1.0 / (prev_layer ** 0.5)
            w_e = jax.random.uniform(
                k1, (prev_layer, layer), jnp.float32, -bound_e, bound_e)
            b_e = jax.random.uniform(k2, (1, layer), jnp.float32, -bound_e, bound_e)
            self.enc_params.append((w_e, b_e))

            bound_d = 1.0 / (layer ** 0.5)
            w_d = jax.random.uniform(
                k3, (layer, prev_layer), jnp.float32, -bound_d, bound_d)
            b_d = jax.random.uniform(
                k4, (1, prev_layer), jnp.float32, -bound_d, bound_d)
            dec_build.append((w_d, b_d))
            prev_layer = layer

        # Matches nn.ModuleList(reversed(decoders)) in the PyTorch module.
        self.dec_params = list(reversed(dec_build))

        # ---- forward schedule fed to the fused kernel ----------------------
        # No nonlinearity between the last encoder Linear and the first
        # decoder Linear, so compose them exactly on the host:
        #   (x @ We + be) @ Wd + bd  ==  x @ (We @ Wd) + (be @ Wd + bd)
        # This removes both lane-sparse bottleneck (width-32) matmuls.
        w_el, b_el = self.enc_params[-1]
        w_d0, b_d0 = self.dec_params[0]
        w_fuse = w_el @ w_d0
        b_fuse = b_el @ w_d0 + b_d0
        self.fwd_params = (
            list(self.enc_params[:-1]) + [(w_fuse, b_fuse)]
            + list(self.dec_params[1:])
        )
        # Every remaining layer is followed by a sigmoid (the fused bottleneck
        # layer inherits the first decoder's sigmoid).
        self.fwd_sigmoid = [True] * len(self.fwd_params)

    def __call__(self, x):
        return fused_forward(x, self.fwd_params, self.fwd_sigmoid)


# ---------------------------------------------------------------------------
# Pure-JAX reference implementing the ORIGINAL (unfused, f32) forward.
# ---------------------------------------------------------------------------
def reference_forward(model, x):
    n = len(model.enc_params)
    for i, (w, b) in enumerate(model.enc_params):
        x = x @ w + b
        if i != n - 1:
            x = jax.nn.sigmoid(x)
    for w, b in model.dec_params:
        x = jax.nn.sigmoid(x @ w + b)
    return x


if __name__ == "__main__":
    key = jax.random.PRNGKey(0)
    key, x_key, x2_key, p_key = jax.random.split(key, 4)

    # Small, self-consistent shapes: input dim 256, hidden 128, bottleneck 32.
    layers = [256, 128, 32]
    model = NaiveDeepAutoencoderPallas(layers, p_key)

    # --- small batch: single 8-row tile, no padding -------------------------
    batch = 8
    x = jax.random.normal(x_key, (batch, layers[0]), jnp.float32)
    out = jax.block_until_ready(model(x))
    ref = jax.block_until_ready(reference_forward(model, x))
    assert out.shape == (batch, layers[0]), out.shape
    err = float(jnp.max(jnp.abs(out - ref)))
    # bf16 MXU operands + exact bottleneck fusion -> relaxed tolerance.
    assert err < 2e-2, f"mismatch vs reference (small batch), max abs err={err}"

    # --- larger batch: exercises multi-tile grid + ragged-tail padding ------
    batch2 = 300
    x2 = jax.random.normal(x2_key, (batch2, layers[0]), jnp.float32)
    out2 = jax.block_until_ready(model(x2))
    ref2 = jax.block_until_ready(reference_forward(model, x2))
    assert out2.shape == (batch2, layers[0]), out2.shape
    err2 = float(jnp.max(jnp.abs(out2 - ref2)))
    assert err2 < 2e-2, f"mismatch vs reference (large batch), max abs err={err2}"

    print("KERNEL_OK")
</pallas_src>

<mosaic_0001>
module attributes {stable_mosaic.version = 11 : i64} {
  func.func @_fused_forward_kernel(%arg0: i32, %arg1: memref<8x256xf32, #tpu.memory_space<vmem>>, %arg2: memref<256x128xbf16, #tpu.memory_space<vmem>>, %arg3: memref<1x128xf32, #tpu.memory_space<vmem>>, %arg4: memref<128x128xbf16, #tpu.memory_space<vmem>>, %arg5: memref<1x128xf32, #tpu.memory_space<vmem>>, %arg6: memref<128x256xbf16, #tpu.memory_space<vmem>>, %arg7: memref<1x256xf32, #tpu.memory_space<vmem>>, %arg8: memref<8x256xf32, #tpu.memory_space<vmem>>) attributes {dimension_semantics = [#tpu.dimension_semantics<parallel>], iteration_bounds = array<i64: 1>, scalar_prefetch = 0 : i64, scratch_operands = 0 : i64, tpu.core_type = #tpu.core_type<tc>, window_params = [{transform_indices = @transform_0, window_bounds = array<i64: 8, 256>}, {pipeline_mode = #tpu.pipeline_mode<synchronous>, transform_indices = @transform_1, window_bounds = array<i64: 256, 128>}, {pipeline_mode = #tpu.pipeline_mode<synchronous>, transform_indices = @transform_2, window_bounds = array<i64: 1, 128>}, {pipeline_mode = #tpu.pipeline_mode<synchronous>, transform_indices = @transform_3, window_bounds = array<i64: 128, 128>}, {pipeline_mode = #tpu.pipeline_mode<synchronous>, transform_indices = @transform_4, window_bounds = array<i64: 1, 128>}, {pipeline_mode = #tpu.pipeline_mode<synchronous>, transform_indices = @transform_5, window_bounds = array<i64: 128, 256>}, {pipeline_mode = #tpu.pipeline_mode<synchronous>, transform_indices = @transform_6, window_bounds = array<i64: 1, 256>}, {transform_indices = @transform_7, window_bounds = array<i64: 8, 256>}]} {
    %c0 = arith.constant 0 : index
    %c0_0 = arith.constant 0 : index
    %0 = vector.load %arg1[%c0, %c0_0] : memref<8x256xf32, #tpu.memory_space<vmem>>, vector<8x256xf32>
    %c0_1 = arith.constant 0 : index
    %c0_2 = arith.constant 0 : index
    %1 = vector.load %arg2[%c0_1, %c0_2] : memref<256x128xbf16, #tpu.memory_space<vmem>>, vector<256x128xbf16>
    %c0_3 = arith.constant 0 : index
    %c0_4 = arith.constant 0 : index
    %2 = vector.load %arg3[%c0_3, %c0_4] : memref<1x128xf32, #tpu.memory_space<vmem>>, vector<1x128xf32>
    %3 = arith.truncf %0 : vector<8x256xf32> to vector<8x256xbf16>
    %cst = arith.constant dense<0.000000e+00> : vector<8x128xf32>
    %4 = tpu.matmul %3, %1, %cst {dimension_numbers = #tpu.dot_dimension_numbers<[1], [0], [0], [1], [0, 0, 1, 1], [], []>} : vector<8x256xbf16>, vector<256x128xbf16>, vector<8x128xf32> -> vector<8x128xf32>
    %5 = vector.broadcast %2 : vector<1x128xf32> to vector<8x128xf32>
    %6 = arith.addf %4, %5 : vector<8x128xf32>
    %cst_5 = arith.constant 5.000000e-01 : f32
    %7 = vector.broadcast %cst_5 : f32 to vector<8x128xf32>
    %8 = arith.mulf %7, %6 : vector<8x128xf32>
    %9 = math.tanh %8 : vector<8x128xf32>
    %cst_6 = arith.constant 5.000000e-01 : f32
    %10 = vector.broadcast %cst_6 : f32 to vector<8x128xf32>
    %11 = arith.mulf %10, %9 : vector<8x128xf32>
    %cst_7 = arith.constant 5.000000e-01 : f32
    %12 = vector.broadcast %cst_7 : f32 to vector<8x128xf32>
    %13 = arith.addf %11, %12 : vector<8x128xf32>
    %c0_8 = arith.constant 0 : index
    %c0_9 = arith.constant 0 : index
    %14 = vector.load %arg4[%c0_8, %c0_9] : memref<128x128xbf16, #tpu.memory_space<vmem>>, vector<128x128xbf16>
    %c0_10 = arith.constant 0 : index
    %c0_11 = arith.constant 0 : index
    %15 = vector.load %arg5[%c0_10, %c0_11] : memref<1x128xf32, #tpu.memory_space<vmem>>, vector<1x128xf32>
    %16 = arith.truncf %13 : vector<8x128xf32> to vector<8x128xbf16>
    %cst_12 = arith.constant dense<0.000000e+00> : vector<8x128xf32>
    %17 = tpu.matmul %16, %14, %cst_12 {dimension_numbers = #tpu.dot_dimension_numbers<[1], [0], [0], [1], [0, 0, 1, 1], [], []>} : vector<8x128xbf16>, vector<128x128xbf16>, vector<8x128xf32> -> vector<8x128xf32>
    %18 = vector.broadcast %15 : vector<1x128xf32> to vector<8x128xf32>
    %19 = arith.addf %17, %18 : vector<8x128xf32>
    %cst_13 = arith.constant 5.000000e-01 : f32
    %20 = vector.broadcast %cst_13 : f32 to vector<8x128xf32>
    %21 = arith.mulf %20, %19 : vector<8x128xf32>
    %22 = math.tanh %21 : vector<8x128xf32>
    %cst_14 = arith.constant 5.000000e-01 : f32
    %23 = vector.broadcast %cst_14 : f32 to vector<8x128xf32>
    %24 = arith.mulf %23, %22 : vector<8x128xf32>
    %cst_15 = arith.constant 5.000000e-01 : f32
    %25 = vector.broadcast %cst_15 : f32 to vector<8x128xf32>
    %26 = arith.addf %24, %25 : vector<8x128xf32>
    %c0_16 = arith.constant 0 : index
    %c0_17 = arith.constant 0 : index
    %27 = vector.load %arg6[%c0_16, %c0_17] : memref<128x256xbf16, #tpu.memory_space<vmem>>, vector<128x256xbf16>
    %c0_18 = arith.constant 0 : index
    %c0_19 = arith.constant 0 : index
    %28 = vector.load %arg7[%c0_18, %c0_19] : memref<1x256xf32, #tpu.memory_space<vmem>>, vector<1x256xf32>
    %29 = arith.truncf %26 : vector<8x128xf32> to vector<8x128xbf16>
    %cst_20 = arith.constant dense<0.000000e+00> : vector<8x256xf32>
    %30 = tpu.matmul %29, %27, %cst_20 {dimension_numbers = #tpu.dot_dimension_numbers<[1], [0], [0], [1], [0, 0, 1, 1], [], []>} : vector<8x128xbf16>, vector<128x256xbf16>, vector<8x256xf32> -> vector<8x256xf32>
    %31 = vector.broadcast %28 : vector<1x256xf32> to vector<8x256xf32>
    %32 = arith.addf %30, %31 : vector<8x256xf32>
    %cst_21 = arith.constant 5.000000e-01 : f32
    %33 = vector.broadcast %cst_21 : f32 to vector<8x256xf32>
    %34 = arith.mulf %33, %32 : vector<8x256xf32>
    %35 = math.tanh %34 : vector<8x256xf32>
    %cst_22 = arith.constant 5.000000e-01 : f32
    %36 = vector.broadcast %cst_22 : f32 to vector<8x256xf32>
    %37 = arith.mulf %36, %35 : vector<8x256xf32>
    %cst_23 = arith.constant 5.000000e-01 : f32
    %38 = vector.broadcast %cst_23 : f32 to vector<8x256xf32>
    %39 = arith.addf %37, %38 : vector<8x256xf32>
    %c0_24 = arith.constant 0 : index
    %c0_25 = arith.constant 0 : index
    %40 = vector.load %arg8[%c0_24, %c0_25] : memref<8x256xf32, #tpu.memory_space<vmem>>, vector<8x256xf32>
    tpu.vector_store %arg8[%c0_24, %c0_25], %39 {strides = array<i32>} : memref<8x256xf32, #tpu.memory_space<vmem>>, vector<8x256xf32>,
    return
  }
  func.func @transform_0(%arg0: i32) -> (i32, i32) {
    %c0_i32 = arith.constant 0 : i32
    %c0_i32_0 = arith.constant 0 : i32
    return %arg0, %c0_i32 : i32, i32
  }
  func.func @transform_1(%arg0: i32) -> (i32, i32) {
    %c0_i32 = arith.constant 0 : i32
    %c0_i32_0 = arith.constant 0 : i32
    %c0_i32_1 = arith.constant 0 : i32
    return %c0_i32, %c0_i32_0 : i32, i32
  }
  func.func @transform_2(%arg0: i32) -> (i32, i32) {
    %c0_i32 = arith.constant 0 : i32
    %c0_i32_0 = arith.constant 0 : i32
    %c0_i32_1 = arith.constant 0 : i32
    return %c0_i32, %c0_i32_0 : i32, i32
  }
  func.func @transform_3(%arg0: i32) -> (i32, i32) {
    %c0_i32 = arith.constant 0 : i32
    %c0_i32_0 = arith.constant 0 : i32
    %c0_i32_1 = arith.constant 0 : i32
    return %c0_i32, %c0_i32_0 : i32, i32
  }
  func.func @transform_4(%arg0: i32) -> (i32, i32) {
    %c0_i32 = arith.constant 0 : i32
    %c0_i32_0 = arith.constant 0 : i32
    %c0_i32_1 = arith.constant 0 : i32
    return %c0_i32, %c0_i32_0 : i32, i32
  }
  func.func @transform_5(%arg0: i32) -> (i32, i32) {
    %c0_i32 = arith.constant 0 : i32
    %c0_i32_0 = arith.constant 0 : i32
    %c0_i32_1 = arith.constant 0 : i32
    return %c0_i32, %c0_i32_0 : i32, i32
  }
  func.func @transform_6(%arg0: i32) -> (i32, i32) {
    %c0_i32 = arith.constant 0 : i32
    %c0_i32_0 = arith.constant 0 : i32
    %c0_i32_1 = arith.constant 0 : i32
    return %c0_i32, %c0_i32_0 : i32, i32
  }
  func.func @transform_7(%arg0: i32) -> (i32, i32) {
    %c0_i32 = arith.constant 0 : i32
    %c0_i32_0 = arith.constant 0 : i32
    return %arg0, %c0_i32 : i32, i32
  }
}

</mosaic_0001>

<bundles_post_ra>
// kernel: tpu_custom_call.1
= control target key start
LH: loop header
LB: loop body
LE: loop exit
PB: predicated region body
PF: predicated region fallthrough
CT: control target
= control target key end

     0   :  { %12 = vsyncpa [#allocation3], 0  ;;  %s963_s0 = inlined_call_operand.hbm [shape: f32[8,256], index: 0, kind: input, shape index: {}]   ;;  %s964_s1 = inlined_call_operand.hbm [shape: bf16[256,128], index: 1, kind: input, shape index: {}]   ;;  %s965_s2 = inlined_call_operand.vmem [shape: f32[1,128], index: 2, kind: input, shape index: {}]   ;;  %s966_s3 = inlined_call_operand.hbm [shape: bf16[128,128], index: 3, kind: input, shape index: {}]   ;;  %s967_s4 = inlined_call_operand.vmem [shape: f32[1,128], index: 4, kind: input, shape index: {}]   ;;  %s968_s5 = inlined_call_operand.hbm [shape: bf16[128,256], index: 5, kind: input, shape index: {}]   ;;  %s969_s6 = inlined_call_operand.vmem [shape: f32[1,256], index: 6, kind: input, shape index: {}]   ;;  %s970_s7 = inlined_call_operand.hbm [shape: f32[8,256], index: 7, kind: output, shape index: {}]  }
   0x1   :  { %13 = vsyncpa [#allocation6], 0 }
   0x2   :  { %14 = vsyncpa [#allocation9], 0 }
   0x3   :  { %15 = vsyncpa [#allocation4], 0  ;;  %s836_s24 = smov [#allocation5]   ;;  %s718_s28 = scalar_lea.hbm %s964_s1, 2048 }
   0x4   :  { %s31_s25 = sshll.u32 %s836_s24, 4  ;;  %p719_p0 = scmp.ne.s32.totalorder %s964_s1, %s718_s28  ;;  %s32_s25 = int_to_ptr.vmem [resolvable:$true] %s31_s25 }
   0x5   :  { %p722_p1 = scmp.lt.u32.totalorder %s718_s28, %s964_s1 }
   0x7   :  { %p724_p2 = pnand %p722_p1, %p719_p0 }
   0x9   :  { %727 = shalt.err (!%p724_p2)
}
   0xa   :  { %s728_s10 = scalar_lea.vmem %s32_s25, 2048  ;;  %p733_p4 = scmp.lt.s32.totalorder %s32_s25, %s32_s25 }
   0xb   :  { %p729_p3 = scmp.ne.s32.totalorder %s32_s25, %s728_s10  ;;  %p734_p5 = scmp.lt.s32.totalorder %s728_s10, %s728_s10 }
   0xd   :  { %p735_p6 = por %p734_p5, %p733_p4 }
   0xf   :  { %p736_p7 = pnand %p735_p6, %p729_p3 }
  0x11   :  { %739 = shalt.err (!%p736_p7)
}
  0x12   :  { %s837_s11 = smov 64   ;;  %s838_s12 = smov 4  }
  0x13   :  { %37 = dma.hbm_to_vmem [thread:$0]  %s964_s1, 2048, %s32_s25, [#allocation6], %s837_s11, %s837_s11, %s838_s12  }
  0x14   :  { %s839_s15 = smov [#allocation2]   ;;  %s840_s17 = smov [#allocation7]  }
  0x15   :  { %s22_s16 = sshll.u32 %s839_s15, 4  ;;  %s45_s18 = sshll.u32 %s840_s17, 4  ;;  %s23_s16 = int_to_ptr.vmem [resolvable:$true] %s22_s16  ;;  %s46_s18 = int_to_ptr.vmem [resolvable:$true] %s45_s18 }
  0x16   :  { %s740_s21 = scalar_lea.hbm %s963_s0, 256 }
  0x17   :  { %p741_p8 = scmp.ne.s32.totalorder %s963_s0, %s740_s21  ;;  %p744_p9 = scmp.lt.u32.totalorder %s740_s21, %s963_s0 }
  0x19   :  { %p746_p10 = pnand %p744_p9, %p741_p8 }
  0x1b   :  { %749 = shalt.err (!%p746_p10)
}
  0x1c   :  { %s750_s1 = scalar_lea.vmem %s23_s16, 256  ;;  %p755_p12 = scmp.lt.s32.totalorder %s23_s16, %s23_s16 }
  0x1d   :  { %p751_p11 = scmp.ne.s32.totalorder %s23_s16, %s750_s1  ;;  %p756_p13 = scmp.lt.s32.totalorder %s750_s1, %s750_s1 }
  0x1f   :  { %p757_p0 = por %p756_p13, %p755_p12 }
  0x21   :  { %p758_p1 = pnand %p757_p0, %p751_p11 }
  0x23   :  { %761 = shalt.err (!%p758_p1)
}
  0x24   :  { %25 = dma.hbm_to_vmem [thread:$0]  %s963_s0, 256, %s23_s16, [#allocation3]  }
  0x25   :  { %s762_s30 = scalar_lea.hbm %s966_s3, 1024 }
  0x26   :  { %p763_p2 = scmp.ne.s32.totalorder %s966_s3, %s762_s30  ;;  %p766_p3 = scmp.lt.u32.totalorder %s762_s30, %s966_s3 }
  0x28   :  { %p768_p4 = pnand %p766_p3, %p763_p2 }
  0x2a   :  { %771 = shalt.err (!%p768_p4)
}
  0x2b   :  { %s772_s14 = scalar_lea.vmem %s46_s18, 1024  ;;  %p777_p6 = scmp.lt.s32.totalorder %s46_s18, %s46_s18 }
  0x2c   :  { %p773_p5 = scmp.ne.s32.totalorder %s46_s18, %s772_s14  ;;  %p778_p7 = scmp.lt.s32.totalorder %s772_s14, %s772_s14 }
  0x2e   :  { %p779_p8 = por %p778_p7, %p777_p6 }
  0x30   :  { %p780_p9 = pnand %p779_p8, %p773_p5 }
  0x32   :  { %783 = shalt.err (!%p780_p9)
}
  0x33   :  { %51 = dma.hbm_to_vmem [thread:$0]  %s966_s3, 1024, %s46_s18, [#allocation6], %s837_s11, %s837_s11, %s838_s12  }
  0x34   :  { %s841_s16 = smov [#allocation8]   ;;  %s784_s21 = scalar_lea.hbm %s968_s5, 2048 }
  0x35   :  { %s59_s17 = sshll.u32 %s841_s16, 4  ;;  %p785_p10 = scmp.ne.s32.totalorder %s968_s5, %s784_s21  ;;  %s60_s17 = int_to_ptr.vmem [resolvable:$true] %s59_s17 }
  0x36   :  { %p788_p11 = scmp.lt.u32.totalorder %s784_s21, %s968_s5 }
  0x38   :  { %p790_p12 = pnand %p788_p11, %p785_p10 }
  0x3a   :  { %793 = shalt.err (!%p790_p12)
}
  0x3b   :  { %s794_s1 = scalar_lea.vmem %s60_s17, 2048  ;;  %p799_p0 = scmp.lt.s32.totalorder %s60_s17, %s60_s17 }
  0x3c   :  { %p795_p13 = scmp.ne.s32.totalorder %s60_s17, %s794_s1  ;;  %p800_p1 = scmp.lt.s32.totalorder %s794_s1, %s794_s1 }
  0x3e   :  { %p801_p2 = por %p800_p1, %p799_p0 }
  0x40   :  { %p802_p3 = pnand %p801_p2, %p795_p13 }
  0x42   :  { %805 = shalt.err (!%p802_p3)
}
  0x43   :  { %s842_s3 = smov 128   ;;  %s843_s11 = smov 8  }
  0x44   :  { %65 = dma.hbm_to_vmem [thread:$0]  %s968_s5, 2048, %s60_s17, [#allocation9], %s842_s3, %s842_s3, %s843_s11  }
  0x45   :  { %828 = dma.done.wait [#allocation3], 256  }
  0x46   :  { %829 = vsyncadd [#allocation3], 4294967040 }
  0x47   :  { %830 = dma.done.wait [#allocation6], 3072  }
  0x48   :  { %831 = vsyncadd [#allocation6], 4294964224 }
  0x49   :  { %832 = dma.done.wait [#allocation9], 2048  }
  0x4a   :  { %833 = vsyncadd [#allocation9], 4294965248  ;;  %v844_v0 = vmov 0.0   ;;  %v662_v1 = vld [vmem:[#allocation5 + $0x40] sm:$0xff]   ;;  %v664_v3 = vld [vmem:[#allocation5 + $0x48] sm:$0xff]   ;;  %vm845_vm0 = vmmov 0  }
  0x4b   :  { %630 = vmatprep.subr.bf16.mxu1 %v844_v0  ;;  %v663_v2 = vld [vmem:[#allocation5] sm:$0xff]   ;;  %599 = vmatprep.subr.bf16.mxu0 %v662_v1  ;;  %v665_v4 = vld [vmem:[#allocation5 + $0x8] sm:$0xff]   ;;  %v666_v5 = vld [vmem:[#allocation5 + $0x50] sm:$0xff]   ;;  %v846_v57 = vmov 0  }
  0x4c   :  { %600 = vmatpush3.bf16.msra.mxu0 %v663_v2  ;;  %v667_v6 = vld [vmem:[#allocation5 + $0x10] sm:$0xff]   ;;  %v668_v7 = vld [vmem:[#allocation5 + $0x58] sm:$0xff]   ;;  %v670_v9 = vld [vmem:[#allocation5 + $0x60] sm:$0xff]   ;;  %646 = vmatprep.mubr.msk.bf16.mxu1 %vm845_vm0, %v844_v0 }
  0x4d   :  { %601 = vmatprep.subr.bf16.mxu0 %v664_v3  ;;  %v669_v8 = vld [vmem:[#allocation5 + $0x18] sm:$0xff]   ;;  %v671_v10 = vld [vmem:[#allocation5 + $0x20] sm:$0xff]   ;;  %v672_v11 = vld [vmem:[#allocation5 + $0x68] sm:$0xff]  }
  0x4e   :  { %v82_v12 = vld [vmem:[#allocation2 + $0x8] sm:$0xff]  ;;  %v673_v13 = vld [vmem:[#allocation5 + $0x28] sm:$0xff]   ;;  %v678_v15 = vld [vmem:[#allocation7] sm:$0xff]  }
  0x4f   :  { %v117_v14 = vpack.c.bf16 %v82_v12, %v82_v12  ;;  %v674_v16 = vld [vmem:[#allocation5 + $0x70] sm:$0xff]   ;;  %v679_v17 = vld [vmem:[#allocation7 + $0x8] sm:$0xff]   ;;  %631 = vmatpush3.bf16.msra.mxu1 %v678_v15  ;;  %v676_v19 = vld [vmem:[#allocation5 + $0x78] sm:$0xff]  }
  0x50   :  { %602 = vmatpush3.bf16.msra.mxu0 %v665_v4  ;;  %v675_v18 = vld [vmem:[#allocation5 + $0x30] sm:$0xff]   ;;  %632 = vmatprep.subr.bf16.mxu1 %v844_v0  ;;  %v677_v20 = vld [vmem:[#allocation5 + $0x38] sm:$0xff]   ;;  %v682_v25 = vld [vmem:[#allocation7 + $0x20] sm:$0xff]  }
  0x51   :  { %603 = vmatprep.subr.bf16.mxu0 %v666_v5  ;;  %252 = vmatprep.mubr.bf16.mxu0 %v117_v14  ;;  %v81_v21 = vld [vmem:[#allocation2] sm:$0xff]  ;;  %v681_v24 = vld [vmem:[#allocation7 + $0x18] sm:$0xff]   ;;  %v683_v26 = vld [vmem:[#allocation7 + $0x28] sm:$0xff]   ;;  %v399_v5 = vlaneseq }
  0x52   :  { %v116_v22 = vpack.c.bf16 %v81_v21, %v81_v21  ;;  %v680_v23 = vld [vmem:[#allocation7 + $0x10] sm:$0xff]   ;;  %v685_v28 = vld [vmem:[#allocation7 + $0x38] sm:$0xff]   ;;  %v686_v29 = vld [vmem:[#allocation8] ss:$8 sps:$4 sm:$0xff]  }
  0x53   :  { %633 = vmatpush3.bf16.msra.mxu1 %v679_v17  ;;  %v684_v27 = vld [vmem:[#allocation7 + $0x30] sm:$0xff]   ;;  %v688_v30 = vld [vmem:[#allocation8 + $0x4] ss:$8 sps:$4 sm:$0xff]   ;;  %v692_v34 = vld [vmem:[#allocation8 + $0x20] ss:$8 sps:$4 sm:$0xff]  }
  0x54   :  { %604 = vmatpush3.bf16.msra.mxu0 %v667_v6  ;;  %634 = vmatprep.subr.bf16.mxu1 %v844_v0  ;;  %v691_v31 = vld [vmem:[#allocation8 + $0x14] ss:$8 sps:$4 sm:$0xff]   ;;  %v689_v32 = vld [vmem:[#allocation8 + $0x10] ss:$8 sps:$4 sm:$0xff]   ;;  %v694_v33 = vld [vmem:[#allocation8 + $0x24] ss:$8 sps:$4 sm:$0xff]  }
  0x55   :  { %605 = vmatprep.subr.bf16.mxu0 %v668_v7  ;;  %v557_v36 = vld [vmem:[%s965_s2] ss:$0 sm:$0xff]  ;;  %v697_v47 = vld [vmem:[#allocation8 + $0x34] ss:$8 sps:$4 sm:$0xff]   ;;  %v700_v49 = vld [vmem:[#allocation8 + $0x44] ss:$8 sps:$4 sm:$0xff]  }
  0x56   :  { %v695_v48 = vld [vmem:[#allocation8 + $0x30] ss:$8 sps:$4 sm:$0xff]   ;;  %v698_v50 = vld [vmem:[#allocation8 + $0x40] ss:$8 sps:$4 sm:$0xff]   ;;  %v703_v51 = vld [vmem:[#allocation8 + $0x54] ss:$8 sps:$4 sm:$0xff]  }
  0x57   :  { %635 = vmatpush3.bf16.msra.mxu1 %v680_v23  ;;  %v701_v52 = vld [vmem:[#allocation8 + $0x50] ss:$8 sps:$4 sm:$0xff]   ;;  %v706_v53 = vld [vmem:[#allocation8 + $0x64] ss:$8 sps:$4 sm:$0xff]   ;;  %v704_v54 = vld [vmem:[#allocation8 + $0x60] ss:$8 sps:$4 sm:$0xff]  }
  0x58   :  { %606 = vmatpush3.bf16.msra.mxu0 %v669_v8  ;;  %636 = vmatprep.subr.bf16.mxu1 %v844_v0  ;;  %v709_v55 = vld [vmem:[#allocation8 + $0x74] ss:$8 sps:$4 sm:$0xff]   ;;  %v707_v56 = vld [vmem:[#allocation8 + $0x70] ss:$8 sps:$4 sm:$0xff]   ;;  %v400_v6 = vshrl.u32 %v399_v5, 7 }
  0x59   :  { %607 = vmatprep.subr.bf16.mxu0 %v670_v9  ;;  %v574_v58 = vld [vmem:[%s967_s4] ss:$0 sm:$0xff]  ;;  %s847_s4 = smov [#allocation10]  }
  0x5a   :  { %v401_v7 = vsub.s32 0, %v400_v6  ;;  %v396_v8 = vld [vmem:[%s969_s6] sm:$0x3]  ;;  %v405_v9 = vsub.s32 1, %v400_v6  ;;  %s546_s30 = sshll.u32 %s847_s4, 4  ;;  %s547_s30 = int_to_ptr.vmem [resolvable:$true] %s546_s30 }
  0x5b   :  { %637 = vmatpush3.bf16.msra.mxu1 %v681_v24  ;;  %s806_s6 = scalar_lea.vmem %s547_s30, 256  ;;  %p811_p5 = scmp.lt.s32.totalorder %s547_s30, %s547_s30 }
  0x5c   :  { %608 = vmatpush3.bf16.msra.mxu0 %v671_v10  ;;  %638 = vmatprep.subr.bf16.mxu1 %v844_v0  ;;  %v402_v10 = vrot.slane %v396_v8, %v401_v7  ;;  %p807_p4 = scmp.ne.s32.totalorder %s547_s30, %s806_s6  ;;  %p812_p6 = scmp.lt.s32.totalorder %s806_s6, %s806_s6 }
  0x5d   :  { %609 = vmatprep.subr.bf16.mxu0 %v672_v11  ;;  %v406_v11 = vrot.slane %v396_v8, %v405_v9 }
  0x5e   :  { %p813_p7 = por %p812_p6, %p811_p5 }
  0x5f   :  { %639 = vmatpush3.bf16.msra.mxu1 %v682_v25 }
  0x60   :  { %610 = vmatpush3.bf16.msra.mxu0 %v673_v13  ;;  %640 = vmatprep.subr.bf16.mxu1 %v844_v0  ;;  %p814_p8 = pnand %p813_p7, %p807_p4 }
  0x61   :  { %611 = vmatprep.subr.bf16.mxu0 %v674_v16 }
  0x63   :  { %641 = vmatpush3.bf16.msra.mxu1 %v683_v26 }
  0x64   :  { %612 = vmatpush3.bf16.msra.mxu0 %v675_v18  ;;  %642 = vmatprep.subr.bf16.mxu1 %v844_v0 }
  0x65   :  { %613 = vmatprep.subr.bf16.mxu0 %v676_v19 }
  0x67   :  { %643 = vmatpush3.bf16.msra.mxu1 %v684_v27 }
  0x68   :  { %614 = vmatpush3.bf16.msra.mxu0 %v677_v20  ;;  %644 = vmatprep.subr.bf16.mxu1 %v844_v0 }
  0x69   :  { %489 = vmatprep.subr.bf16.mxu0 %v688_v30 }
  0x6b   :  { %253 = vmatmul.mubr.bf16.vlgmr.msra.gmra.mrb[0].mxu0 %v116_v22  ;;  %645 = vmatpush3.bf16.msra.mxu1 %v685_v28 }
  0x6c   :  { %490 = vmatpush1.bf16.msra.mxu0 %v686_v29  ;;  %521 = vmatprep.mubr.bf16.mxu0 %v846_v57 }
  0x6d   :  { %491 = vmatprep.subr.bf16.mxu0 %v691_v31 }
  0x70   :  { %492 = vmatpush1.bf16.msra.mxu0 %v689_v32 }
  0x71   :  { %493 = vmatprep.subr.bf16.mxu0 %v694_v33 }
  0x74   :  { %494 = vmatpush1.bf16.msra.mxu0 %v692_v34 }
  0x75   :  { %495 = vmatprep.subr.bf16.mxu0 %v697_v47 }
  0x78   :  { %496 = vmatpush1.bf16.msra.mxu0 %v695_v48 }
  0x79   :  { %497 = vmatprep.subr.bf16.mxu0 %v700_v49 }
  0x7c   :  { %498 = vmatpush1.bf16.msra.mxu0 %v698_v50 }
  0x7d   :  { %499 = vmatprep.subr.bf16.mxu0 %v703_v51 }
  0x80   :  { %500 = vmatpush1.bf16.msra.mxu0 %v701_v52 }
  0x81   :  { %501 = vmatprep.subr.bf16.mxu0 %v706_v53 }
  0x84   :  { %502 = vmatpush1.bf16.msra.mxu0 %v704_v54 }
  0x85   :  { %503 = vmatprep.subr.bf16.mxu0 %v709_v55 }
  0x88   :  { %504 = vmatpush1.bf16.msra.mxu0 %v707_v56 }
 0x13e   :  { %v615_v35 = vpop.f32.mrb[0].mxu0 }
 0x13f   :  { %v616_v37 = vpop.f32.mrb[1].mxu0 }
 0x140   :  { %v617_v38 = vadd.f32 %v616_v37, %v615_v35  ;;  %v618_v39 = vpop.f32.mrb[2].mxu0 }
 0x141   :  { %v619_v40 = vpop.f32.mrb[3].mxu0 }
 0x142   :  { %v255_v41 = vadd.f32 %v617_v38, %v557_v36 }
 0x144   :  { %v260_v42 = vmul.f32 0.5, %v255_v41 }
 0x146   :  { %710 = vtanh.f32 %v260_v42 }
 0x150   :  { %v711_v43 = vpop.eup %710 }
 0x151   :  { %v262_v44 = vmul.f32 0.5, %v711_v43 }
 0x153   :  { %v263_v45 = vadd.f32 0.5, %v262_v44 }
 0x155   :  { %v281_v46 = vpack.c.bf16 %v263_v45, %v263_v45 }
 0x157   :  { %647 = vmatmul.mubr.bf16.vlgmr.msra.gmra.mrb[0].mxu1 %v281_v46 }
 0x22a   :  { %v370_v59 = vpop.f32.mrb[0].mxu1 }
 0x22b   :  { %v371_v60 = vadd.f32 %v574_v58, %v370_v59  ;;  %v648_v61 = vpop.f32.mrb[1].mxu1 }
 0x22c   :  { %v373_v62 = vpop.f32.mrb[2].mxu1 }
 0x22d   :  { %v376_v63 = vmul.f32 0.5, %v371_v60  ;;  %v649_v0 = vpop.f32.mrb[3].mxu1 }
 0x22f   :  { %712 = vtanh.f32 %v376_v63 }
 0x239   :  { %v713_v1 = vpop.eup %712 }
 0x23a   :  { %v378_v2 = vmul.f32 0.5, %v713_v1 }
 0x23c   :  { %v379_v3 = vadd.f32 0.5, %v378_v2 }
 0x23e   :  { %v397_v4 = vpack.c.bf16 %v379_v3, %v379_v3 }
 0x240   :  { %522 = vmatmul.mubr.bf16.vlgmr.msra.gmra.mrb[4].mxu0 %v397_v4 }
 0x313   :  { %v523_v12 = vpop.f32.mrb[4].mxu0 }
 0x314   :  { %v524_v13 = vadd.f32 %v523_v12, %v402_v10  ;;  %v525_v14 = vpop.f32.mrb[5].mxu0 }
 0x315   :  { %v526_v15 = vadd.f32 %v525_v14, %v406_v11  ;;  %v527_v16 = vpop.f32.mrb[6].mxu0 }
 0x316   :  { %v530_v17 = vmul.f32 0.5, %v524_v13  ;;  %v528_v18 = vpop.f32.mrb[7].mxu0 }
 0x317   :  { %v531_v19 = vmul.f32 0.5, %v526_v15 }
 0x318   :  { %714 = vtanh.f32 %v530_v17 }
 0x319   :  { %716 = vtanh.f32 %v531_v19 }
 0x322   :  { %v715_v20 = vpop.eup %714 }
 0x323   :  { %v717_v21 = vpop.eup %716  ;;  %v534_v22 = vmul.f32 0.5, %v715_v20 }
 0x324   :  { %v535_v23 = vmul.f32 0.5, %v717_v21 }
 0x325   :  { %v536_v24 = vadd.f32 0.5, %v534_v22 }
 0x326   :  { %v537_v25 = vadd.f32 0.5, %v535_v23 }
 0x327   :  { %538 = vst [vmem:[#allocation10] sm:$0xff] %v536_v24 }
 0x328   :  { %539 = vst [vmem:[#allocation10 + $0x8] sm:$0xff] %v537_v25 }
 0x329   :  { %817 = shalt.err (!%p814_p8)
}
 0x32a   :  { %s818_s10 = scalar_lea.hbm %s970_s7, 256 }
 0x32b   :  { %p819_p9 = scmp.ne.s32.totalorder %s970_s7, %s818_s10  ;;  %p822_p10 = scmp.lt.u32.totalorder %s818_s10, %s970_s7 }
 0x32d   :  { %p824_p11 = pnand %p822_p10, %p819_p9 }
 0x32f   :  { %827 = shalt.err (!%p824_p11)
}
 0x330   :  { %549 = dma.vmem_to_hbm [thread:$0]  %s547_s30, 256, %s970_s7, [#allocation4]  }
 0x331   :  { %834 = dma.done.wait [#allocation4], 256  }
 0x332   :  { %835 = vsyncadd [#allocation4], 4294967040 }
 0x333   :  { %553 = vsyncpa [#allocation3], 1 }
 0x334   :  { %554 = vsyncpa [#allocation6], 1 }
 0x335   :  { %555 = vsyncpa [#allocation9], 1 }
 0x336   :  { %556 = vsyncpa [#allocation4], 1 }

</bundles_post_ra>
